<compile_context>
chip_gen: v6e
topology: v6e:2x2x1
jax: 0.10.0
libtpu: 0.0.40
codegen_flags: <defaults>
</compile_context>

<pallas_src>
import functools

import jax
import jax.numpy as jnp
import numpy as np
from jax.experimental import pallas as pl
from jax.experimental.pallas import tpu as pltpu

LANE = 128


def _round_up(n, m):
    return ((n + m - 1) // m) * m


# ----------------------------------------------------------------------------
# Fused kernel: conv (im2col matmul, folded bias) + ReLU + GAP accumulation
#               + scene FC + privacy FC.  Grid = (batch, HW tiles).
# ----------------------------------------------------------------------------
def fused_kernel(patches_ref, wconv_ref, wfc_ref, whead_ref, out_ref, acc_ref,
                 *, hw, c_mid, n_scene, np_pad):
    t = pl.program_id(1)

    @pl.when(t == 0)
    def _init():
        acc_ref[...] = jnp.zeros_like(acc_ref)

    # Backbone conv for this tile of patch rows (bf16 MXU, f32 accumulate).
    # The conv bias rides inside the matmul via the ones column of the patches.
    conv = jnp.dot(patches_ref[0], wconv_ref[...],
                   preferred_element_type=jnp.float32)          # (tile, Cp)
    conv = jnp.maximum(conv, 0.0)                               # ReLU

    # Global-average-pool partial sum: sublane reduction (XLU), no MXU.
    acc_ref[...] += jnp.sum(conv, axis=0, keepdims=True)        # (1, Cp)

    @pl.when(t == pl.num_programs(1) - 1)
    def _finalize():
        pooled = acc_ref[...] * (1.0 / hw)                      # (1, Cp) f32
        # Inject 1.0 into the first padding lane -> folded scene-FC bias.
        lane_c = jax.lax.broadcasted_iota(jnp.int32, pooled.shape, 1)
        pooled = jnp.where(lane_c == c_mid, 1.0, pooled)
        # Scene FC (tiny 1-row matmul, kept in f32 for precision).
        scene = jnp.dot(pooled, wfc_ref[...],
                        preferred_element_type=jnp.float32)     # (1, Np)
        # scene_to_privacy_layer (Xavier W, zero bias; bias folded anyway).
        lane_n = jax.lax.broadcasted_iota(jnp.int32, scene.shape, 1)
        scene_aug = jnp.where(lane_n == n_scene, 1.0, scene)
        priv = jnp.dot(scene_aug, whead_ref[...],
                       preferred_element_type=jnp.float32)      # (1, Op)
        # Single lane-dense output slab: [scene | priv].
        out_ref[0, :, :np_pad] = scene
        out_ref[0, :, np_pad:] = priv


# ----------------------------------------------------------------------------
# Wrapper: layout conversion, im2col, bias folding, pallas_call plumbing
# ----------------------------------------------------------------------------
def im2col_3x3(x_nhwc):
    """Extract 3x3 (pad=1, stride=1) patches -> (B, H*W, 9*C)."""
    B, H, W, C = x_nhwc.shape
    xp = jnp.pad(x_nhwc, ((0, 0), (1, 1), (1, 1), (0, 0)))
    cols = []
    for dh in range(3):
        for dw in range(3):
            cols.append(xp[:, dh:dh + H, dw:dw + W, :])
    return jnp.concatenate(cols, axis=-1).reshape(B, H * W, 9 * C)


def _fold_bias(w, b, rows_p, cols_p):
    """Zero-pad w to (rows_p, cols_p) and put the bias in row fan_in."""
    fan_in, fan_out = w.shape
    wp = jnp.zeros((rows_p, cols_p), jnp.float32)
    wp = wp.at[:fan_in, :fan_out].set(w)
    return wp.at[fan_in, :fan_out].set(b.reshape(-1))


def scene_to_privacy_forward(img_nchw, params, *, tile_rows=128):
    """img [B,C,H,W] -> (privacy_logits [B,n_out], scene_logits [B,Nscene])."""
    B, C, H, W = img_nchw.shape
    HW = H * W
    wconv, bconv = params["wconv"], params["bconv"]      # (9C, Cmid), (1, Cmid)
    wfc, bfc = params["wfc"], params["bfc"]              # (Cmid, Nsc), (1, Nsc)
    whead, bhead = params["whead"], params["bhead"]      # (Nsc, n_out), (1, n_out)

    K, c_mid = wconv.shape
    n_scene = wfc.shape[1]
    n_out = whead.shape[1]
    # +1 leaves room for the folded-bias row / injected-1.0 lane.
    # TODO(synk): when scaling to the real model (Nscene=365, 2048 features),
    #             pad N/K to 256 on v6e/v7x (256-wide MXU); 128 is right here / v5e.
    Kp = _round_up(K + 1, 32)
    Cp = _round_up(c_mid + 1, LANE)
    Np = _round_up(n_scene + 1, LANE)
    Op = _round_up(n_out, LANE)

    if HW % tile_rows != 0:
        tile_rows = HW            # TODO(synk): pad HW rows for odd spatial sizes
    n_tiles = HW // tile_rows

    # NCHW -> NHWC -> im2col; K padded only to 32 (NOT 128), with the spare
    # column set to 1.0 so the conv bias is folded into the conv matmul.
    x = jnp.transpose(img_nchw, (0, 2, 3, 1))
    patches = im2col_3x3(x)                                     # (B, HW, K)
    patches = jnp.pad(patches, ((0, 0), (0, 0), (0, Kp - K)))
    patches = patches.at[:, :, K].set(1.0).astype(jnp.bfloat16)

    wconv_p = _fold_bias(wconv, bconv, Kp, Cp).astype(jnp.bfloat16)
    wfc_p = _fold_bias(wfc, bfc, Cp, Np)                        # f32 (tiny FC)
    whead_p = _fold_bias(whead, bhead, Np, Op)                  # f32 (tiny FC)

    kernel = functools.partial(fused_kernel, hw=HW, c_mid=c_mid,
                               n_scene=n_scene, np_pad=Np)
    out = pl.pallas_call(
        kernel,
        out_shape=jax.ShapeDtypeStruct((B, 1, Np + Op), jnp.float32),
        grid=(B, n_tiles),
        in_specs=[
            pl.BlockSpec((1, tile_rows, Kp), lambda b, t: (b, t, 0)),
            pl.BlockSpec((Kp, Cp), lambda b, t: (0, 0)),
            pl.BlockSpec((Cp, Np), lambda b, t: (0, 0)),
            pl.BlockSpec((Np, Op), lambda b, t: (0, 0)),
        ],
        out_specs=pl.BlockSpec((1, 1, Np + Op), lambda b, t: (b, 0, 0)),
        scratch_shapes=[pltpu.VMEM((1, Cp), jnp.float32)],
        compiler_params=pltpu.CompilerParams(
            dimension_semantics=("parallel", "arbitrary")),
    )(patches, wconv_p, wfc_p, whead_p)

    scene_logits = out[:, 0, :n_scene]
    privacy_logits = out[:, 0, Np:Np + n_out]
    return privacy_logits, scene_logits


# ----------------------------------------------------------------------------
# Deterministic parameter construction
# ----------------------------------------------------------------------------
def xavier_uniform(key, fan_in, fan_out):
    bound = float(np.sqrt(6.0 / (fan_in + fan_out)))
    return jax.random.uniform(key, (fan_in, fan_out), jnp.float32,
                              minval=-bound, maxval=bound)


def build_params(key, c_in, c_mid, num_scene_cat, num_out_classes):
    k = jax.random.split(key, 5)
    # Synthetic backbone weights (stand-in for the frozen pretrained ResNet-50).
    wconv = jax.random.normal(k[0], (9 * c_in, c_mid), jnp.float32) * 0.1
    bconv = jax.random.normal(k[1], (1, c_mid), jnp.float32) * 0.1
    wfc = jax.random.normal(k[2], (c_mid, num_scene_cat), jnp.float32) * 0.1
    bfc = jax.random.normal(k[3], (1, num_scene_cat), jnp.float32) * 0.1
    # scene_to_privacy_layer: Xavier-uniform weight, zero bias.
    whead = xavier_uniform(k[4], num_scene_cat, num_out_classes)
    bhead = jnp.zeros((1, num_out_classes), jnp.float32)
    return {"wconv": wconv, "bconv": bconv, "wfc": wfc, "bfc": bfc,
            "whead": whead, "bhead": bhead}


# ----------------------------------------------------------------------------
# Pure-JAX reference (sanity check)
# ----------------------------------------------------------------------------
def reference_forward(img, params):
    x = jnp.transpose(img, (0, 2, 3, 1))
    patches = im2col_3x3(x)
    conv = jnp.maximum(patches @ params["wconv"] + params["bconv"], 0.0)
    pooled = conv.mean(axis=1)
    scene = pooled @ params["wfc"] + params["bfc"][0]
    priv = scene @ params["whead"] + params["bhead"][0]
    return priv, scene


# ----------------------------------------------------------------------------
if __name__ == "__main__":
    B, C, H, W = 2, 3, 16, 16          # small NCHW input, PyTorch convention
    C_MID = 32                         # synthetic backbone hidden channels
    NUM_SCENE_CAT = 32                 # (365 in the real Places365 model)
    NUM_OUT_CLASSES = 4                # privacy classes (b_bce=False path)

    key = jax.random.PRNGKey(0)
    k_img, k_par = jax.random.split(key)
    img = jax.random.normal(k_img, (B, C, H, W), jnp.float32)
    params = build_params(k_par, C, C_MID, NUM_SCENE_CAT, NUM_OUT_CLASSES)

    fwd = jax.jit(functools.partial(scene_to_privacy_forward, params=params))
    privacy_logits, scene_logits = fwd(img)
    jax.block_until_ready((privacy_logits, scene_logits))

    ref_priv, ref_scene = reference_forward(img, params)
    np.testing.assert_allclose(np.asarray(scene_logits), np.asarray(ref_scene),
                               rtol=2e-2, atol=2e-2)
    np.testing.assert_allclose(np.asarray(privacy_logits), np.asarray(ref_priv),
                               rtol=2e-2, atol=2e-2)
    assert privacy_logits.shape == (B, NUM_OUT_CLASSES)
    assert scene_logits.shape == (B, NUM_SCENE_CAT)

    print("KERNEL_OK")
</pallas_src>

<mosaic_0001>
module attributes {stable_mosaic.version = 11 : i64} {
  func.func @fused_kernel(%arg0: i32, %arg1: i32, %arg2: memref<1x128x32xbf16, #tpu.memory_space<vmem>>, %arg3: memref<32x128xbf16, #tpu.memory_space<vmem>>, %arg4: memref<128x128xf32, #tpu.memory_space<vmem>>, %arg5: memref<128x128xf32, #tpu.memory_space<vmem>>, %arg6: memref<1x1x256xf32, #tpu.memory_space<vmem>>, %arg7: memref<1x128xf32, #tpu.memory_space<vmem>>) attributes {dimension_semantics = [#tpu.dimension_semantics<parallel>, #tpu.dimension_semantics<arbitrary>], iteration_bounds = array<i64: 2, 2>, scalar_prefetch = 0 : i64, scratch_operands = 1 : i64, tpu.core_type = #tpu.core_type<tc>, window_params = [{transform_indices = @transform_0, window_bounds = array<i64: 1, 128, 32>}, {pipeline_mode = #tpu.pipeline_mode<synchronous>, transform_indices = @transform_1, window_bounds = array<i64: 32, 128>}, {pipeline_mode = #tpu.pipeline_mode<synchronous>, transform_indices = @transform_2, window_bounds = array<i64: 128, 128>}, {pipeline_mode = #tpu.pipeline_mode<synchronous>, transform_indices = @transform_3, window_bounds = array<i64: 128, 128>}, {transform_indices = @transform_4, window_bounds = array<i64: 1, 1, 256>}]} {
    %c0_i32 = arith.constant 0 : i32
    %0 = arith.cmpi eq, %arg1, %c0_i32 : i32
    %1 = arith.extui %0 : i1 to i32
    %c0_i32_0 = arith.constant 0 : i32
    %2 = arith.cmpi ne, %1, %c0_i32_0 : i32
    scf.if %2 {
      %cst_12 = arith.constant 0.000000e+00 : f32
      %17 = vector.broadcast %cst_12 : f32 to vector<1x128xf32>
      %c0_13 = arith.constant 0 : index
      %c0_14 = arith.constant 0 : index
      %18 = vector.load %arg7[%c0_13, %c0_14] : memref<1x128xf32, #tpu.memory_space<vmem>>, vector<1x128xf32>
      tpu.vector_store %arg7[%c0_13, %c0_14], %17 {strides = array<i32>} : memref<1x128xf32, #tpu.memory_space<vmem>>, vector<1x128xf32>,
    } else {
    }
    %c0 = arith.constant 0 : index
    %c0_1 = arith.constant 0 : index
    %c0_2 = arith.constant 0 : index
    %3 = vector.load %arg2[%c0, %c0_1, %c0_2] : memref<1x128x32xbf16, #tpu.memory_space<vmem>>, vector<1x128x32xbf16>
    %4 = vector.shape_cast %3 : vector<1x128x32xbf16> to vector<128x32xbf16>
    %c0_3 = arith.constant 0 : index
    %c0_4 = arith.constant 0 : index
    %5 = vector.load %arg3[%c0_3, %c0_4] : memref<32x128xbf16, #tpu.memory_space<vmem>>, vector<32x128xbf16>
    %cst = arith.constant dense<0.000000e+00> : vector<128x128xf32>
    %6 = tpu.matmul %4, %5, %cst {dimension_numbers = #tpu.dot_dimension_numbers<[1], [0], [0], [1], [0, 0, 1, 1], [], []>} : vector<128x32xbf16>, vector<32x128xbf16>, vector<128x128xf32> -> vector<128x128xf32>
    %cst_5 = arith.constant 0.000000e+00 : f32
    %7 = vector.broadcast %cst_5 : f32 to vector<128x128xf32>
    %8 = arith.maximumf %6, %7 : vector<128x128xf32>
    %c0_6 = arith.constant 0 : index
    %c0_7 = arith.constant 0 : index
    %9 = vector.load %arg7[%c0_6, %c0_7] : memref<1x128xf32, #tpu.memory_space<vmem>>, vector<1x128xf32>
    %cst_8 = arith.constant dense<0.000000e+00> : vector<128xf32>
    %10 = vector.multi_reduction <add>, %8, %cst_8 [0] : vector<128x128xf32> to vector<128xf32>
    %11 = vector.shape_cast %10 : vector<128xf32> to vector<1x128xf32>
    %12 = arith.addf %9, %11 : vector<1x128xf32>
    %c0_9 = arith.constant 0 : index
    %c0_10 = arith.constant 0 : index
    %13 = vector.load %arg7[%c0_9, %c0_10] : memref<1x128xf32, #tpu.memory_space<vmem>>, vector<1x128xf32>
    tpu.vector_store %arg7[%c0_9, %c0_10], %12 {strides = array<i32>} : memref<1x128xf32, #tpu.memory_space<vmem>>, vector<1x128xf32>,
    %c1_i32 = arith.constant 1 : i32
    %14 = arith.cmpi eq, %arg1, %c1_i32 : i32
    %15 = arith.extui %14 : i1 to i32
    %c0_i32_11 = arith.constant 0 : i32
    %16 = arith.cmpi ne, %15, %c0_i32_11 : i32
    scf.if %16 {
      %c0_12 = arith.constant 0 : index
      %c0_13 = arith.constant 0 : index
      %17 = vector.load %arg7[%c0_12, %c0_13] : memref<1x128xf32, #tpu.memory_space<vmem>>, vector<1x128xf32>
      %cst_14 = arith.constant 3.906250e-03 : f32
      %18 = vector.broadcast %cst_14 : f32 to vector<1x128xf32>
      %19 = arith.mulf %17, %18 : vector<1x128xf32>
      %20 = tpu.iota {dimensions = array<i32: 1>} : vector<1x128xi32>
      %c32_i32 = arith.constant 32 : i32
      %21 = vector.broadcast %c32_i32 : i32 to vector<1x128xi32>
      %22 = arith.cmpi eq, %20, %21 : vector<1x128xi32>
      %cst_15 = arith.constant 1.000000e+00 : f32
      %23 = vector.broadcast %cst_15 : f32 to vector<1x128xf32>
      %24 = arith.select %22, %23, %19 : vector<1x128xi1>, vector<1x128xf32>
      %c0_16 = arith.constant 0 : index
      %c0_17 = arith.constant 0 : index
      %25 = vector.load %arg4[%c0_16, %c0_17] : memref<128x128xf32, #tpu.memory_space<vmem>>, vector<128x128xf32>
      %cst_18 = arith.constant dense<0.000000e+00> : vector<1x128xf32>
      %26 = tpu.matmul %24, %25, %cst_18 {dimension_numbers = #tpu.dot_dimension_numbers<[1], [0], [0], [1], [0, 0, 1, 1], [], []>} : vector<1x128xf32>, vector<128x128xf32>, vector<1x128xf32> -> vector<1x128xf32>
      %27 = tpu.iota {dimensions = array<i32: 1>} : vector<1x128xi32>
      %c32_i32_19 = arith.constant 32 : i32
      %28 = vector.broadcast %c32_i32_19 : i32 to vector<1x128xi32>
      %29 = arith.cmpi eq, %27, %28 : vector<1x128xi32>
      %cst_20 = arith.constant 1.000000e+00 : f32
      %30 = vector.broadcast %cst_20 : f32 to vector<1x128xf32>
      %31 = arith.select %29, %30, %26 : vector<1x128xi1>, vector<1x128xf32>
      %c0_21 = arith.constant 0 : index
      %c0_22 = arith.constant 0 : index
      %32 = vector.load %arg5[%c0_21, %c0_22] : memref<128x128xf32, #tpu.memory_space<vmem>>, vector<128x128xf32>
      %cst_23 = arith.constant dense<0.000000e+00> : vector<1x128xf32>
      %33 = tpu.matmul %31, %32, %cst_23 {dimension_numbers = #tpu.dot_dimension_numbers<[1], [0], [0], [1], [0, 0, 1, 1], [], []>} : vector<1x128xf32>, vector<128x128xf32>, vector<1x128xf32> -> vector<1x128xf32>
      %c0_24 = arith.constant 0 : index
      %c0_25 = arith.constant 0 : index
      %c0_26 = arith.constant 0 : index
      %34 = vector.load %arg6[%c0_24, %c0_25, %c0_26] : memref<1x1x256xf32, #tpu.memory_space<vmem>>, vector<1x1x128xf32>
      %35 = vector.shape_cast %34 : vector<1x1x128xf32> to vector<1x128xf32>
      %36 = vector.shape_cast %26 : vector<1x128xf32> to vector<1x1x128xf32>
      tpu.vector_store %arg6[%c0_24, %c0_25, %c0_26], %36 {strides = array<i32>} : memref<1x1x256xf32, #tpu.memory_space<vmem>>, vector<1x1x128xf32>,
      %c0_27 = arith.constant 0 : index
      %c0_28 = arith.constant 0 : index
      %c128 = arith.constant 128 : index
      %37 = vector.load %arg6[%c0_27, %c0_28, %c128] : memref<1x1x256xf32, #tpu.memory_space<vmem>>, vector<1x1x128xf32>
      %38 = vector.shape_cast %37 : vector<1x1x128xf32> to vector<1x128xf32>
      %39 = vector.shape_cast %33 : vector<1x128xf32> to vector<1x1x128xf32>
      tpu.vector_store %arg6[%c0_27, %c0_28, %c128], %39 {strides = array<i32>} : memref<1x1x256xf32, #tpu.memory_space<vmem>>, vector<1x1x128xf32>,
    } else {
    }
    return
  }
  func.func @transform_0(%arg0: i32, %arg1: i32) -> (i32, i32, i32) {
    %c0_i32 = arith.constant 0 : i32
    %c0_i32_0 = arith.constant 0 : i32
    return %arg0, %arg1, %c0_i32 : i32, i32, i32
  }
  func.func @transform_1(%arg0: i32, %arg1: i32) -> (i32, i32) {
    %c0_i32 = arith.constant 0 : i32
    %c0_i32_0 = arith.constant 0 : i32
    %c0_i32_1 = arith.constant 0 : i32
    return %c0_i32, %c0_i32_0 : i32, i32
  }
  func.func @transform_2(%arg0: i32, %arg1: i32) -> (i32, i32) {
    %c0_i32 = arith.constant 0 : i32
    %c0_i32_0 = arith.constant 0 : i32
    %c0_i32_1 = arith.constant 0 : i32
    return %c0_i32, %c0_i32_0 : i32, i32
  }
  func.func @transform_3(%arg0: i32, %arg1: i32) -> (i32, i32) {
    %c0_i32 = arith.constant 0 : i32
    %c0_i32_0 = arith.constant 0 : i32
    %c0_i32_1 = arith.constant 0 : i32
    return %c0_i32, %c0_i32_0 : i32, i32
  }
  func.func @transform_4(%arg0: i32, %arg1: i32) -> (i32, i32, i32) {
    %c0_i32 = arith.constant 0 : i32
    %c0_i32_0 = arith.constant 0 : i32
    %c0_i32_1 = arith.constant 0 : i32
    return %arg0, %c0_i32, %c0_i32_0 : i32, i32, i32
  }
}

</mosaic_0001>

<bundles_post_ra>
// kernel: scene_to_privacy_forward.1
= control target key start
LH: loop header
LB: loop body
LE: loop exit
PB: predicated region body
PF: predicated region fallthrough
CT: control target
= control target key end

     0   :  { %s1013_s15 = smov 0   ;;  %s1015_s16 = smov 0   ;;  %s1219_s0 = inlined_call_operand.vmem [shape: bf16[2,256,32], index: 0, kind: input, shape index: {}]   ;;  %s1220_s1 = inlined_call_operand.vmem [shape: bf16[32,128], index: 1, kind: input, shape index: {}]   ;;  %s1221_s2 = inlined_call_operand.vmem [shape: f32[128,128], index: 2, kind: input, shape index: {}]   ;;  %s1222_s3 = inlined_call_operand.vmem [shape: f32[128,128], index: 3, kind: input, shape index: {}]   ;;  %s1223_s4 = inlined_call_operand.vmem [shape: f32[2,1,256], index: 4, kind: output, shape index: {}]  }
   0x1   :  { %s1017_s17 = smov 0   ;;  %s1019_s18 = smov 0  }
   0x2   :  { %s1021_s19 = smov 0  }
   0x3 LB: > { %s23_s20 = sadd.s32 1, %s975_s17  ;;  %s26_s21 = sadd.s32 1, %s979_s18  ;;  %s983_s19 = sphi %s1021_s19, %s14_s19   ;;  %s979_s18 = sphi %s1019_s18, %s1227_s18   ;;  %s975_s17 = sphi %s1017_s17, %s1226_s17   ;;  %s971_s16 = sphi %s1015_s16, %s1225_s16   ;;  %s967_s15 = sphi %s1013_s15, %s1224_s15  }
   0x4   : > { %p24_p0 = scmp.ge.s32.totalorder %s23_s20, 2  ;;  %p727_p1 = scmp.ge.s32.totalorder %s983_s19, 1 }
   0x5   : > { %p181_p2 = scmp.lt.s32.totalorder %s983_s19, 5 }
   0x6   : > { %s1229_s20 = smov (%p24_p0, %s23_s20), 0  ;;  %s1231_s21 = smov (!%p24_p0, %s26_s21), %s979_s18 }
   0x7   : > { %p182_p3 = pnand %p727_p1, %p181_p2  ;;  %p28_p4 = scmp.ge.s32.totalorder %s1231_s21, 2 }
   0x8   : > { %s728_s22 = sshll.u32 (!%p182_p3), %s967_s15, 4  ;;  %p211_p5 = scmp.lt.s32.totalorder (!%p182_p3), %s971_s16, 1 }
   0x9   : > { %s1233_s21 = smov (%p28_p4, %s1231_s21), 0  ;;  %185 = sbr.rel (%p182_p3) target bundleno = 701 (0x2bd), region = 36 }
   0xa   : > { %p213_p6 = scmp.lt.s32.totalorder (!%p182_p3), %s728_s22, 31  ;;  %p732_p7 = scmp.ne.s32.totalorder (!%p182_p3), %s967_s15, 0 }
   0xe   : > { %s1235_s16 = smov (!%p211_p5, %s971_s16), 1  ;;  %s1237_s22 = smov (!%p213_p6, %s728_s22), 31 }
   0xf   : > { %s729_s23 = sshll.u32 %s1235_s16, 5  ;;  %s731_s24 = sshll.u32 %s1235_s16, 1 }
  0x10   : > { %s216_s25 = sadd.s32 %s729_s23, %s1237_s22  ;;  %s1049_s28 = scalar_lea.vmem %s1223_s4, %s731_s24 }
  0x11   : > { %s730_s29 = sshll.u32 %s216_s25, 2  ;;  %228 = sbr.rel (%p732_p7) target bundleno = 24 (0x18), region = 40 }
  0x12   : > { %s218_s6 = scalar_lea.vmem %s1219_s0, %s730_s29 }
  0x16   : > { %v985_v0 = vmov 0.0  }
  0x17   : > { %229 = vst [vmem:[#allocation2] sm:$0x1] %v985_v0 }
  0x18 PF: > { %v935_v1 = vld [vmem:[%s1220_s1 + $0x8] sm:$0xff]   ;;  %v936_v2 = vld [vmem:[%s1220_s1] sm:$0xff]   ;;  %vm302_vm0 = vcmask 261120   ;;  %v939_v5 = vld [vmem:[%s218_s6 + $0x10] sm:$0xff]   ;;  %p751_p8 = scmp.ne.s32.totalorder %s967_s15, 1 }
  0x19   : > { %798 = vmatprep.subr.bf16.mxu0 %v935_v1  ;;  %v937_v3 = vld [vmem:[%s218_s6] sm:$0xff]   ;;  %888 = vmatprep.subr.bf16.mxu1 %v935_v1  ;;  %v938_v4 = vld [vmem:[%s218_s6 + $0x8] sm:$0xff]   ;;  %v943_v8 = vld [vmem:[%s218_s6 + $0x30] sm:$0xff]  }
  0x1a   : > { %799 = vmatpush3.bf16.msra.mxu0 %v935_v1  ;;  %890 = vmatpush3.bf16.msra.mxu1 %v935_v1  ;;  %v941_v6 = vld [vmem:[%s218_s6 + $0x20] sm:$0xff]   ;;  %v942_v7 = vld [vmem:[%s218_s6 + $0x28] sm:$0xff]   ;;  %v940_v9 = vld [vmem:[%s218_s6 + $0x18] sm:$0xff]  }
  0x1b   : > { %800 = vmatprep.subr.bf16.mxu0 %v936_v2  ;;  %802 = vmatprep.mubr.msk.bf16.mxu0 %vm302_vm0, %v937_v3  ;;  %v944_v10 = vld [vmem:[%s218_s6 + $0x38] sm:$0xff]  }
  0x1c   : > { %889 = vmatprep.subr.bf16.mxu1 %v936_v2  ;;  %810 = vmatprep.mubr.msk.bf16.mxu1 %vm302_vm0, %v941_v6 }
  0x1e   : > { %801 = vmatpush3.bf16.msra.mxu0 %v936_v2  ;;  %891 = vmatpush3.bf16.msra.mxu1 %v936_v2  ;;  %v440_v63 = vld [vmem:[#allocation2] sm:$0x1] }
  0x21   : > { %803 = vmatmul.mubr.msk.bf16.vlgmr.msra.gmra.mxu0 %vm302_vm0, %v938_v4  ;;  %811 = vmatmul.mubr.msk.bf16.vlgmr.msra.gmra.mxu1 %vm302_vm0, %v942_v7 }
  0x22   : > { %806 = vmatprep.mubr.msk.bf16.mxu0 %vm302_vm0, %v939_v5  ;;  %814 = vmatprep.mubr.msk.bf16.mxu1 %vm302_vm0, %v943_v8 }
  0x29   : > { %807 = vmatmul.mubr.msk.bf16.gmra.mxu0 %vm302_vm0, %v940_v9  ;;  %815 = vmatmul.mubr.msk.bf16.gmra.mxu1 %vm302_vm0, %v944_v10 }
  0xe1   : > { %v804_v11 = vpop.f32.mrf.mxu0  ;;  %v812_v12 = vpop.f32.mrf.mxu1 }
  0xe2   : > { %v426_v21 = vmax.f32 %v804_v11, 0.0  ;;  %v434_v44 = vmax.f32 %v812_v12, 0.0 }
  0xe3   : > { %v361_v13 = vpop.f32.mrf.mxu0  ;;  %v393_v15 = vpop.f32.mrf.mxu1 }
  0xe4   : > { %v424_v17 = vmax.f32 %v361_v13, 0.0  ;;  %v432_v39 = vmax.f32 %v393_v15, 0.0 }
  0xe5   : > { %v805_v14 = vpop.f32.mrf.mxu0  ;;  %v813_v20 = vpop.f32.mrf.mxu1 }
  0xe6   : > { %v427_v24 = vmax.f32 %v805_v14, 0.0  ;;  %v435_v46 = vmax.f32 %v813_v20, 0.0 }
  0xe7   : > { %v364_v16 = vpop.f32.mrf.mxu0  ;;  %v396_v27 = vpop.f32.mrf.mxu1 }
  0xe8   : > { %v425_v18 = vmax.f32 %v364_v16, 0.0  ;;  %v433_v41 = vmax.f32 %v396_v27, 0.0 }
  0xe9   : > { %v808_v19 = vpop.f32.mrf.mxu0  ;;  %v816_v33 = vpop.f32.mrf.mxu1 }
  0xea   : > { %v441_v22 = vadd.f32 %v425_v18, %v424_v17  ;;  %v430_v34 = vmax.f32 %v808_v19, 0.0  ;;  %v438_v53 = vmax.f32 %v816_v33, 0.0 }
  0xeb   : > { %v377_v23 = vpop.f32.mrf.mxu0  ;;  %v409_v38 = vpop.f32.mrf.mxu1 }
  0xec   : > { %v442_v25 = vadd.f32 %v441_v22, %v426_v21  ;;  %v428_v28 = vmax.f32 %v377_v23, 0.0  ;;  %v436_v49 = vmax.f32 %v409_v38, 0.0 }
  0xed   : > { %v809_v26 = vpop.f32.mrf.mxu0  ;;  %v817_v43 = vpop.f32.mrf.mxu1 }
  0xee   : > { %v443_v29 = vadd.f32 %v442_v25, %v427_v24  ;;  %v431_v36 = vmax.f32 %v809_v26, 0.0  ;;  %v439_v55 = vmax.f32 %v817_v43, 0.0 }
  0xef   : > { %v380_v30 = vpop.f32.mrf.mxu0  ;;  %v412_v48 = vpop.f32.mrf.mxu1 }
  0xf0   : > { %v444_v31 = vadd.f32 %v443_v29, %v428_v28  ;;  %v429_v32 = vmax.f32 %v380_v30, 0.0  ;;  %v437_v52 = vmax.f32 %v412_v48, 0.0 }
  0xf2   : > { %v445_v35 = vadd.f32 %v444_v31, %v429_v32 }
  0xf4   : > { %v446_v37 = vadd.f32 %v445_v35, %v430_v34 }
  0xf6   : > { %v447_v40 = vadd.f32 %v446_v37, %v431_v36 }
  0xf8   : > { %v448_v42 = vadd.f32 %v447_v40, %v432_v39 }
  0xfa   : > { %v449_v45 = vadd.f32 %v448_v42, %v433_v41 }
  0xfc   : > { %v450_v47 = vadd.f32 %v449_v45, %v434_v44 }
  0xfe   : > { %v451_v50 = vadd.f32 %v450_v47, %v435_v46 }
 0x100   : > { %v452_v51 = vadd.f32 %v451_v50, %v436_v49 }
 0x102   : > { %v453_v54 = vadd.f32 %v452_v51, %v437_v52 }
 0x104   : > { %v454_v56 = vadd.f32 %v453_v54, %v438_v53 }
 0x106   : > { %v455_v57 = vadd.f32 %v454_v56, %v439_v55 }
 0x108   : > { %v456_v58 = vrot.slane %v455_v57, 4 }
 0x10a   : > { %v457_v59 = vadd.f32 %v456_v58, %v455_v57 }
 0x10c   : > { %v458_v60 = vrot.slane %v457_v59, 2 }
 0x10e   : > { %v459_v61 = vadd.f32 %v458_v60, %v457_v59 }
 0x110   : > { %v460_v62 = vrot.slane %v459_v61, 1 }
 0x112   : > { %v461_v0 = vadd.f32 %v460_v62, %v459_v61  ;;  %467 = sbr.rel (%p751_p8) target bundleno = 701 (0x2bd), region = 44 }
 0x114   : > { %v462_v1 = vadd.f32 %v461_v0, %v440_v63 }
 0x116   : > { %463 = vst [vmem:[#allocation2] sm:$0x1] %v462_v1 }
 0x117   : > { %v489_v2 = vld [vmem:[%s1221_s2 + $0x78] sm:$0xff]  ;;  %v986_v3 = vmov 0.0   ;;  %v488_v4 = vld [vmem:[%s1221_s2 + $0x70] sm:$0xff]  ;;  %vm987_vm1 = vmmov 0   ;;  %v487_v5 = vld [vmem:[%s1221_s2 + $0x68] sm:$0xff]  ;;  %v470_v22 = vlaneseq }
 0x118   : > { %818 = vmatprep.subr.mxu0 %v986_v3  ;;  %850 = vmatprep.mubr.msk.f32.mxu0 %vm987_vm1, %v986_v3  ;;  %v486_v6 = vld [vmem:[%s1221_s2 + $0x60] sm:$0xff]  ;;  %v576_v7 = vld [vmem:[%s1222_s3 + $0x78] sm:$0xff]  ;;  %v575_v8 = vld [vmem:[%s1222_s3 + $0x70] sm:$0xff] }
 0x119   : > { %819 = vmatpush3.msra.mxu0 %v489_v2  ;;  %853 = vmatprep.subr.mxu1 %v986_v3  ;;  %v485_v9 = vld [vmem:[%s1221_s2 + $0x58] sm:$0xff]  ;;  %v574_v10 = vld [vmem:[%s1222_s3 + $0x68] sm:$0xff]  ;;  %v484_v11 = vld [vmem:[%s1221_s2 + $0x50] sm:$0xff]  ;;  %v471_v28 = vand.u32 127, %v470_v22  ;;  %vm649_vm3 = vcmp.lt.s32.totalorder %v470_v22, 128 }
 0x11a   : > { %820 = vmatprep.subr.mxu0 %v986_v3  ;;  %885 = vmatprep.mubr.msk.f32.mxu1 %vm987_vm1, %v986_v3  ;;  %v573_v12 = vld [vmem:[%s1222_s3 + $0x60] sm:$0xff]  ;;  %v483_v13 = vld [vmem:[%s1221_s2 + $0x48] sm:$0xff]  ;;  %v572_v14 = vld [vmem:[%s1222_s3 + $0x58] sm:$0xff] }
 0x11b   : > { %821 = vmatpush3.msra.mxu0 %v488_v4  ;;  %854 = vmatpush3.msra.mxu1 %v576_v7  ;;  %v482_v15 = vld [vmem:[%s1221_s2 + $0x40] sm:$0xff]  ;;  %v571_v16 = vld [vmem:[%s1222_s3 + $0x50] sm:$0xff]  ;;  %v481_v17 = vld [vmem:[%s1221_s2 + $0x38] sm:$0xff]  ;;  %vm472_vm2 = vcmp.eq.s32.totalorder %v471_v28, 32 }
 0x11c   : > { %822 = vmatprep.subr.mxu0 %v986_v3  ;;  %855 = vmatprep.subr.mxu1 %v986_v3  ;;  %v570_v18 = vld [vmem:[%s1222_s3 + $0x48] sm:$0xff]  ;;  %v480_v19 = vld [vmem:[%s1221_s2 + $0x30] sm:$0xff]  ;;  %v569_v20 = vld [vmem:[%s1222_s3 + $0x40] sm:$0xff] }
 0x11d   : > { %823 = vmatpush3.msra.mxu0 %v487_v5  ;;  %856 = vmatpush3.msra.mxu1 %v575_v8  ;;  %v479_v21 = vld [vmem:[%s1221_s2 + $0x28] sm:$0xff]  ;;  %v568_v23 = vld [vmem:[%s1222_s3 + $0x38] sm:$0xff]  ;;  %v478_v24 = vld [vmem:[%s1221_s2 + $0x20] sm:$0xff] }
 0x11e   : > { %824 = vmatprep.subr.mxu0 %v986_v3  ;;  %857 = vmatprep.subr.mxu1 %v986_v3  ;;  %v567_v25 = vld [vmem:[%s1222_s3 + $0x30] sm:$0xff]  ;;  %v477_v26 = vld [vmem:[%s1221_s2 + $0x18] sm:$0xff]  ;;  %v468_v27 = vld [vmem:[#allocation2] sm:$0x1] }
 0x11f   : > { %825 = vmatpush3.msra.mxu0 %v486_v6  ;;  %858 = vmatpush3.msra.mxu1 %v574_v10  ;;  %v566_v29 = vld [vmem:[%s1222_s3 + $0x28] sm:$0xff]  ;;  %v476_v30 = vld [vmem:[%s1221_s2 + $0x10] sm:$0xff]  ;;  %v565_v31 = vld [vmem:[%s1222_s3 + $0x20] sm:$0xff]  ;;  %v469_v32 = vmul.f32 0.00390625, %v468_v27 }
 0x120   : > { %826 = vmatprep.subr.mxu0 %v986_v3  ;;  %859 = vmatprep.subr.mxu1 %v986_v3  ;;  %v475_v33 = vld [vmem:[%s1221_s2 + $0x8] sm:$0xff]  ;;  %v564_v34 = vld [vmem:[%s1222_s3 + $0x18] sm:$0xff]  ;;  %v474_v35 = vld [vmem:[%s1221_s2] sm:$0xff] }
 0x121   : > { %827 = vmatpush3.msra.mxu0 %v485_v9  ;;  %860 = vmatpush3.msra.mxu1 %v573_v12  ;;  %v563_v36 = vld [vmem:[%s1222_s3 + $0x10] sm:$0xff]  ;;  %v473_v37 = vsel %vm472_vm2, 1.0, %v469_v32  ;;  %v562_v38 = vld [vmem:[%s1222_s3 + $0x8] sm:$0xff]  ;;  %v561_v39 = vld [vmem:[%s1222_s3] sm:$0xff] }
 0x122   : > { %828 = vmatprep.subr.mxu0 %v986_v3  ;;  %861 = vmatprep.subr.mxu1 %v986_v3 }
 0x123   : > { %829 = vmatpush3.msra.mxu0 %v484_v11  ;;  %862 = vmatpush3.msra.mxu1 %v572_v14 }
 0x124   : > { %830 = vmatprep.subr.mxu0 %v986_v3  ;;  %863 = vmatprep.subr.mxu1 %v986_v3 }
 0x125   : > { %831 = vmatpush3.msra.mxu0 %v483_v13  ;;  %864 = vmatpush3.msra.mxu1 %v571_v16 }
 0x126   : > { %832 = vmatprep.subr.mxu0 %v986_v3  ;;  %865 = vmatprep.subr.mxu1 %v986_v3 }
 0x127   : > { %833 = vmatpush3.msra.mxu0 %v482_v15  ;;  %866 = vmatpush3.msra.mxu1 %v570_v18 }
 0x128   : > { %834 = vmatprep.subr.mxu0 %v986_v3  ;;  %867 = vmatprep.subr.mxu1 %v986_v3 }
 0x129   : > { %835 = vmatpush3.msra.mxu0 %v481_v17  ;;  %868 = vmatpush3.msra.mxu1 %v569_v20 }
 0x12a   : > { %836 = vmatprep.subr.mxu0 %v986_v3  ;;  %869 = vmatprep.subr.mxu1 %v986_v3 }
 0x12b   : > { %837 = vmatpush3.msra.mxu0 %v480_v19  ;;  %870 = vmatpush3.msra.mxu1 %v568_v23 }
 0x12c   : > { %838 = vmatprep.subr.mxu0 %v986_v3  ;;  %871 = vmatprep.subr.mxu1 %v986_v3 }
 0x12d   : > { %839 = vmatpush3.msra.mxu0 %v479_v21  ;;  %872 = vmatpush3.msra.mxu1 %v567_v25 }
 0x12e   : > { %840 = vmatprep.subr.mxu0 %v986_v3  ;;  %873 = vmatprep.subr.mxu1 %v986_v3 }
 0x12f   : > { %841 = vmatpush3.msra.mxu0 %v478_v24  ;;  %874 = vmatpush3.msra.mxu1 %v566_v29 }
 0x130   : > { %842 = vmatprep.subr.mxu0 %v986_v3  ;;  %875 = vmatprep.subr.mxu1 %v986_v3 }
 0x131   : > { %843 = vmatpush3.msra.mxu0 %v477_v26  ;;  %876 = vmatpush3.msra.mxu1 %v565_v31 }
 0x132   : > { %844 = vmatprep.subr.mxu0 %v986_v3  ;;  %877 = vmatprep.subr.mxu1 %v986_v3 }
 0x133   : > { %845 = vmatpush3.msra.mxu0 %v476_v30  ;;  %878 = vmatpush3.msra.mxu1 %v564_v34 }
 0x134   : > { %846 = vmatprep.subr.mxu0 %v986_v3  ;;  %879 = vmatprep.subr.mxu1 %v986_v3 }
 0x135   : > { %847 = vmatpush3.msra.mxu0 %v475_v33  ;;  %880 = vmatpush3.msra.mxu1 %v563_v36 }
 0x136   : > { %848 = vmatprep.subr.mxu0 %v986_v3  ;;  %881 = vmatprep.subr.mxu1 %v986_v3 }
 0x137   : > { %849 = vmatpush3.msra.mxu0 %v474_v35  ;;  %882 = vmatpush3.msra.mxu1 %v562_v38 }
 0x138   : > { %851 = vmatmul.mubr.f32.vlgmr.msra.gmra.mxu0 %v473_v37  ;;  %883 = vmatprep.subr.mxu1 %v986_v3 }
 0x139   : > { %884 = vmatpush3.msra.mxu1 %v561_v39 }
 0x1f8   : > { %v556_v40 = vpop.f32.mrf.mxu0 }
 0x1f9   : > { %v560_v41 = vsel %vm472_vm2, 1.0, %v556_v40  ;;  %651 = vst.msk [vmem:[%s1049_s28] sm:$0x1] %vm649_vm3, %v556_v40 }
 0x1fa   : > { %v852_v42 = vpop.f32.mrf.mxu0  ;;  %886 = vmatmul.mubr.f32.vlgmr.msra.gmra.mxu1 %v560_v41 }
 0x2ba   : > { %v643_v43 = vpop.f32.mrf.mxu1 }
 0x2bb   : > { %652 = vst.msk [vmem:[%s1049_s28 + $0x1] sm:$0x1] %vm649_vm3, %v643_v43 }
 0x2bc   : > { %v887_v44 = vpop.f32.mrf.mxu1 }
 0x2bd PF: > { %s14_s19 = sadd.s32 1, %s983_s19   ;;  %s1224_s15 = smov %s975_s17 }
 0x2be   : > { %p11_p9 = scmp.ge.s32.totalorder %s14_s19, 6   ;;  %s1225_s16 = smov %s979_s18 }
 0x2bf   : > { %s1226_s17 = smov %s1229_s20  ;;  %s1227_s18 = smov %s1233_s21 }
 0x2c0   :  { %13 = sbr.rel (!%p11_p9) target bundleno = 3 (0x3), region = 74 }

</bundles_post_ra>
